<compile_context>
chip_gen: v7x
topology: tpu7x:2x2x1
jax: 0.10.0
libtpu: 0.0.40
codegen_flags: <defaults>
</compile_context>

<pallas_src>
import math

import jax
import jax.numpy as jnp
from jax.experimental import pallas as pl
from jax.experimental.pallas import tpu as pltpu


def _sinusoidal_pos_emb_kernel(x_ref, freqs_ref, out_ref):
    # x_ref:    (TB, 1)            f32 in VMEM
    # freqs_ref:(1, half_dim)      f32 in VMEM (same block every grid step)
    # out_ref:  (TB, 2, half_dim)  f32 in VMEM
    arg = x_ref[...] * freqs_ref[...]          # (TB, 1) * (1, H) -> (TB, H)
    out_ref[:, 0, :] = jnp.sin(arg)
    out_ref[:, 1, :] = jnp.cos(arg)


def _round_up(n, m):
    return ((n + m - 1) // m) * m


def _choose_tile_rows(batch, dim):
    # One f32 output tile (TB, dim), double-buffered, must stay well under the
    # 32 MiB default scoped-VMEM limit (and v7x's 64 MiB physical VMEM).
    # Budget ~8 MiB per output buffer; 512-2048 rows already saturates the
    # HBM pipeline, so cap there.
    budget_bytes = 8 * 1024 * 1024
    tb = budget_bytes // (dim * 4)
    tb = max(8, min(2048, (tb // 8) * 8))
    # Never make the tile bigger than the (8-padded) batch itself.
    return min(tb, _round_up(batch, 8))


def sinusoidal_pos_emb(x, dim):
    """JAX/Pallas equivalent of SinusoidalPosEmb(dim)(x) for 1-D x of shape (B,)."""
    assert dim % 2 == 0, "dim must be even"
    assert dim >= 4, "dim must be >= 4 (half_dim - 1 divides by zero otherwise)"
    half_dim = dim // 2
    B = x.shape[0]

    # Frequency table computed once on the host side of the call (resident
    # input, not recomputed per grid step inside the kernel).
    emb_scale = math.log(10000.0) / (half_dim - 1)
    freqs = jnp.exp(
        jnp.arange(half_dim, dtype=jnp.float32) * -emb_scale
    ).reshape(1, half_dim)

    tb = _choose_tile_rows(B, dim)
    b_pad = _round_up(B, tb)

    x2 = x.astype(jnp.float32).reshape(B, 1)
    if b_pad != B:
        # Pad so every tile is full: no masked sublane loads / partial stores.
        x2 = jnp.pad(x2, ((0, b_pad - B), (0, 0)))

    # Double-buffered output + input + resident freqs, with generous slack,
    # stays far below v7x's 64 MiB physical VMEM.
    vmem_est = 2 * (tb * dim * 4) + 2 * (tb * 4) + 2 * (half_dim * 4)
    vmem_limit = min(64 * 1024 * 1024, max(4 * 1024 * 1024, 4 * vmem_est))

    grid = (b_pad // tb,)
    out3 = pl.pallas_call(
        _sinusoidal_pos_emb_kernel,
        out_shape=jax.ShapeDtypeStruct((b_pad, 2, half_dim), jnp.float32),
        grid_spec=pltpu.PrefetchScalarGridSpec(
            num_scalar_prefetch=0,
            grid=grid,
            in_specs=[
                pl.BlockSpec((tb, 1), lambda i: (i, 0)),
                pl.BlockSpec((1, half_dim), lambda i: (0, 0)),  # resident
            ],
            out_specs=pl.BlockSpec((tb, 2, half_dim), lambda i: (i, 0, 0)),
        ),
        compiler_params=pltpu.CompilerParams(
            dimension_semantics=("parallel",),   # shard batch tiles across TCs (v7x)
            vmem_limit_bytes=vmem_limit,
        ),
    )(x2, freqs)

    # Row-major reshape: [sin | cos] per row, then drop the batch padding.
    out = out3.reshape(b_pad, dim)
    return out[:B]
    # TODO(synk): at tiny B*dim (e.g. dim=32) this op is cheaper fused into the
    # downstream time-MLP by XLA; the standalone kernel is kept for the spec.


def _reference(x, dim):
    half_dim = dim // 2
    emb = math.log(10000.0) / (half_dim - 1)
    emb = jnp.exp(jnp.arange(half_dim, dtype=jnp.float32) * -emb)
    emb = x.astype(jnp.float32)[:, None] * emb[None, :]
    return jnp.concatenate([jnp.sin(emb), jnp.cos(emb)], axis=-1)


if __name__ == "__main__":
    key = jax.random.PRNGKey(0)
    DIM = 32

    # Case 1: batch already a multiple of 8.
    B = 8
    x = jax.random.uniform(key, (B,), dtype=jnp.float32, minval=0.0, maxval=1000.0)
    out = jax.block_until_ready(sinusoidal_pos_emb(x, DIM))
    ref = _reference(x, DIM)
    assert out.shape == (B, DIM), out.shape
    assert jnp.allclose(out, ref, atol=1e-5, rtol=1e-5), "mismatch vs reference (B=8)"

    # Case 2: ragged batch (exercises the padding path).
    B2 = 10
    x2 = jax.random.uniform(
        jax.random.PRNGKey(1), (B2,), dtype=jnp.float32, minval=0.0, maxval=1000.0
    )
    out2 = jax.block_until_ready(sinusoidal_pos_emb(x2, DIM))
    ref2 = _reference(x2, DIM)
    assert out2.shape == (B2, DIM), out2.shape
    assert jnp.allclose(out2, ref2, atol=1e-5, rtol=1e-5), "mismatch vs reference (B=10)"

    print("KERNEL_OK")
</pallas_src>

<mosaic_0001>
module attributes {stable_mosaic.version = 11 : i64} {
  func.func @_sinusoidal_pos_emb_kernel(%arg0: i32, %arg1: memref<8x1xf32, #tpu.memory_space<vmem>>, %arg2: memref<1x16xf32, #tpu.memory_space<vmem>>, %arg3: memref<8x2x16xf32, #tpu.memory_space<vmem>>) attributes {dimension_semantics = [#tpu.dimension_semantics<parallel>], iteration_bounds = array<i64: 1>, scalar_prefetch = 0 : i64, scratch_operands = 0 : i64, tpu.core_type = #tpu.core_type<tc>, window_params = [{transform_indices = @transform_0, window_bounds = array<i64: 8, 1>}, {pipeline_mode = #tpu.pipeline_mode<synchronous>, transform_indices = @transform_1, window_bounds = array<i64: 1, 16>}, {transform_indices = @transform_2, window_bounds = array<i64: 8, 2, 16>}]} {
    %c0 = arith.constant 0 : index
    %c0_0 = arith.constant 0 : index
    %0 = vector.load %arg1[%c0, %c0_0] : memref<8x1xf32, #tpu.memory_space<vmem>>, vector<8x1xf32>
    %c0_1 = arith.constant 0 : index
    %c0_2 = arith.constant 0 : index
    %1 = vector.load %arg2[%c0_1, %c0_2] : memref<1x16xf32, #tpu.memory_space<vmem>>, vector<1x16xf32>
    %2 = vector.broadcast %0 : vector<8x1xf32> to vector<8x16xf32>
    %3 = vector.broadcast %1 : vector<1x16xf32> to vector<8x16xf32>
    %4 = arith.mulf %2, %3 : vector<8x16xf32>
    %5 = math.sin %4 : vector<8x16xf32>
    %c0_3 = arith.constant 0 : index
    %c0_4 = arith.constant 0 : index
    %c0_5 = arith.constant 0 : index
    %6 = vector.load %arg3[%c0_3, %c0_4, %c0_5] : memref<8x2x16xf32, #tpu.memory_space<vmem>>, vector<8x1x16xf32>
    %7 = vector.shape_cast %6 : vector<8x1x16xf32> to vector<8x16xf32>
    %8 = vector.shape_cast %5 : vector<8x16xf32> to vector<8x1x16xf32>
    tpu.vector_store %arg3[%c0_3, %c0_4, %c0_5], %8 {strides = array<i32>} : memref<8x2x16xf32, #tpu.memory_space<vmem>>, vector<8x1x16xf32>,
    %9 = math.cos %4 : vector<8x16xf32>
    %c0_6 = arith.constant 0 : index
    %c1 = arith.constant 1 : index
    %c0_7 = arith.constant 0 : index
    %10 = vector.load %arg3[%c0_6, %c1, %c0_7] : memref<8x2x16xf32, #tpu.memory_space<vmem>>, vector<8x1x16xf32>
    %11 = vector.shape_cast %10 : vector<8x1x16xf32> to vector<8x16xf32>
    %12 = vector.shape_cast %9 : vector<8x16xf32> to vector<8x1x16xf32>
    tpu.vector_store %arg3[%c0_6, %c1, %c0_7], %12 {strides = array<i32>} : memref<8x2x16xf32, #tpu.memory_space<vmem>>, vector<8x1x16xf32>,
    return
  }
  func.func @transform_0(%arg0: i32) -> (i32, i32) {
    %c0_i32 = arith.constant 0 : i32
    %c0_i32_0 = arith.constant 0 : i32
    return %arg0, %c0_i32 : i32, i32
  }
  func.func @transform_1(%arg0: i32) -> (i32, i32) {
    %c0_i32 = arith.constant 0 : i32
    %c0_i32_0 = arith.constant 0 : i32
    %c0_i32_1 = arith.constant 0 : i32
    return %c0_i32, %c0_i32_0 : i32, i32
  }
  func.func @transform_2(%arg0: i32) -> (i32, i32, i32) {
    %c0_i32 = arith.constant 0 : i32
    %c0_i32_0 = arith.constant 0 : i32
    %c0_i32_1 = arith.constant 0 : i32
    return %arg0, %c0_i32, %c0_i32_0 : i32, i32, i32
  }
}

</mosaic_0001>

<bundles_post_ra>
// kernel: tpu_custom_call.1
= control target key start
LH: loop header
LB: loop body
LE: loop exit
PB: predicated region body
PF: predicated region fallthrough
CT: control target
= control target key end

     0   :  { %v435_v1 = vmov 0   ;;  %s516_s0 = inlined_call_operand.vmem [shape: f32[8,1], index: 0, kind: input, shape index: {}]   ;;  %s517_s1 = inlined_call_operand.vmem [shape: f32[1,16], index: 1, kind: input, shape index: {}]   ;;  %s518_s2 = inlined_call_operand.hbm [shape: f32[8,2,16], index: 2, kind: output, shape index: {}]  }
   0x1   :  { %v12_v0 = vld [vmem:[%s516_s0] sm:$0xff]  ;;  %406 = vset.pattern.permute.xlu0 %v435_v1 }
   0x2   :  { %16 = vperm.xlu0 %406, %v12_v0  }
   0x3   :  { %7 = vsyncpa [#allocation3], 0  ;;  %v382_v2 = vld [vmem:[%s517_s1] ss:$0 sm:$0xff]  ;;  %v436_v15 = vmov 683565275  }
   0x4   :  { %v437_v17 = vmov 2475754826   ;;  %v438_v20 = vmov 2131351028   ;;  %v439_v23 = vmov 2102212464  }
   0x5   :  { %v440_v26 = vmov 920167782   ;;  %v441_v29 = vmov 1326507024   ;;  %s443_s0 = smov [#allocation2]  }
   0x6   :  { %s371_s1 = sshll.u32 %s443_s0, 4  ;;  %s372_s1 = int_to_ptr.vmem [resolvable:$true] %s371_s1 }
   0x7   :  { %s411_s13 = scalar_lea.vmem %s372_s1, 256  ;;  %p416_p1 = scmp.lt.s32.totalorder %s372_s1, %s372_s1 }
   0x8   :  { %p412_p0 = scmp.ne.s32.totalorder %s372_s1, %s411_s13  ;;  %p417_p2 = scmp.lt.s32.totalorder %s411_s13, %s411_s13 }
   0xa   :  { %p418_p3 = por %p417_p2, %p416_p1 }
   0xc   :  { %p419_p4 = pnand %p418_p3, %p412_p0 }
  0x81   :  { %v17_v3 = vpop.permute.xlu0 %16 }
  0x82   :  { %v467_v4 = vmul.f32 %v382_v2, %v17_v3 }
  0x84   :  { %v29_v5 = vand.u32 2139095040, %v467_v4  ;;  %v26_v9 = vand.u32 2147483647, %v467_v4  ;;  %vm28_vm7 = vcmp.lt.s32.totalorder %v467_v4, 0  ;;  %vm118_vm15 = vweird.f32 %v467_v4 }
  0x86   :  { %v30_v6 = vshrl.u32 %v29_v5, 23  ;;  %v33_v12 = vand.u32 8388607, %v26_v9  ;;  %vm27_vm8 = vcmp.le.f32.partialorder %v26_v9, 0.7853982 }
  0x88   :  { %v383_v7 = vadd.s32 4294967169, %v30_v6  ;;  %v34_v31 = vor.u32 8388608, %v33_v12 }
  0x8a   :  { %v36_v8 = vadd.s32 1, %v383_v7  ;;  %v74_v45 = vshll.u32 %v34_v31, 8 }
  0x8c   :  { %vm37_vm0 = vcmp.gt.s32.totalorder %v36_v8, 0 }
  0x8d   :  { %v38_v10 = vsel %vm37_vm0, %v36_v8, 0  ;;  %vm188_vm0 = vcmask 122880  }
  0x8e   :  { %v40_v11 = vand.u32 31, %v38_v10  ;;  %v39_v14 = vshrl.u32 %v38_v10, 5 }
  0x90   :  { %v41_v13 = vsub.s32 32, %v40_v11  ;;  %v43_v16 = vshll.u32 %v436_v15, %v40_v11  ;;  %v46_v18 = vshll.u32 %v437_v17, %v40_v11  ;;  %v49_v22 = vshll.u32 %v438_v20, %v40_v11 }
  0x91   :  { %v52_v25 = vshll.u32 %v439_v23, %v40_v11  ;;  %v55_v28 = vshll.u32 %v440_v26, %v40_v11  ;;  %vm58_vm1 = vcmp.lt.s32.totalorder %v39_v14, 1  ;;  %vm61_vm2 = vcmp.lt.s32.totalorder %v39_v14, 4 }
  0x92   :  { %v44_v19 = vshrl.u32 %v437_v17, %v41_v13  ;;  %v47_v21 = vshrl.u32 %v438_v20, %v41_v13  ;;  %v50_v24 = vshrl.u32 %v439_v23, %v41_v13  ;;  %v53_v27 = vshrl.u32 %v440_v26, %v41_v13 }
  0x93   :  { %v56_v30 = vshrl.u32 %v441_v29, %v41_v13  ;;  %v42_v40 = vshrl.u32 %v436_v15, %v41_v13  ;;  %vm60_vm3 = vcmp.lt.s32.totalorder %v39_v14, 3  ;;  %vm59_vm4 = vcmp.lt.s32.totalorder %v39_v14, 2 }
  0x94   :  { %v45_v32 = vor.u32 %v44_v19, %v43_v16  ;;  %v48_v33 = vor.u32 %v47_v21, %v46_v18  ;;  %v51_v34 = vor.u32 %v50_v24, %v49_v22  ;;  %v54_v35 = vor.u32 %v53_v27, %v52_v25 }
  0x95   :  { %v57_v36 = vor.u32 %v56_v30, %v55_v28  ;;  %v442_v24 = vmov 1966171168   ;;  %v135_v26 = vlaneseq }
  0x96   :  { %v63_v37 = vsel %vm61_vm2, %v51_v34, 2102212464  ;;  %v66_v38 = vsel %vm58_vm1, %v45_v32, %v48_v33  ;;  %v70_v39 = vsel %vm58_vm1, %v48_v33, %v51_v34  ;;  %v67_v41 = vsel %vm61_vm2, %v54_v35, 920167782 }
  0x97   :  { %v71_v42 = vsel %vm61_vm2, %v57_v36, 1326507024  ;;  %v68_v43 = vsel %vm60_vm3, %v51_v34, %v67_v41  ;;  %v62_v46 = vsel %vm58_vm1, %v42_v40, %v45_v32  ;;  %v64_v47 = vsel %vm60_vm3, %v48_v33, %v63_v37 }
  0x98   :  { %v72_v44 = vsel %vm60_vm3, %v54_v35, %v71_v42  ;;  %v69_v48 = vsel %vm59_vm4, %v66_v38, %v68_v43  ;;  %v65_v54 = vsel %vm59_vm4, %v62_v46, %v64_v47  ;;  %v133_v25 = vunpack.c.l.s4 %v442_v24 }
  0x99   :  { %v73_v49 = vsel %vm59_vm4, %v70_v39, %v72_v44  ;;  %v476_v52 = vmul.u32.u64.low %v74_v45, %v69_v48  ;;  %v477_v53 = vmul.u32.u64.high %v74_v45, %v69_v48, %v476_v52  ;;  %v81_v56 = vmul.u32 %v74_v45, %v65_v54 }
  0x9a   :  { %v473_v50 = vmul.u32.u64.low %v74_v45, %v73_v49  ;;  %v474_v51 = vmul.u32.u64.high %v74_v45, %v73_v49, %v473_v50  ;;  %v134_v28 = vunpack.c.0.s8 %v133_v25  ;;  %v136_v29 = vshrl.u32 %v135_v26, 7 }
  0x9b   :  { %v84_v55 = vadd.s32 1, %v477_v53 }
  0x9c   :  { %vm83_vm5 = vc.u32 %v474_v51, %v476_v52  ;;  %v82_v5 = vadd.s32 %v476_v52, %v474_v51  ;;  %v137_v35 = vsub.s32 %v134_v28, %v136_v29 }
  0x9d   :  { %v85_v57 = vsel %vm83_vm5, %v84_v55, %v477_v53 }
  0x9e   :  { %v86_v58 = vadd.s32 %v85_v57, %v81_v56 }
  0xa0   :  { %v87_v59 = vadd.s32 536870912, %v86_v58 }
  0xa2   :  { %v88_v60 = vshrl.u32 %v87_v59, 30 }
  0xa4   :  { %v89_v61 = vshll.u32 %v88_v60, 30  ;;  %v112_v18 = vsub.s32 4, %v88_v60 }
  0xa6   :  { %v90_v62 = vsub.s32 %v86_v58, %v89_v61  ;;  %v113_v21 = vsel %vm28_vm7, %v112_v18, %v88_v60 }
  0xa7   :  { %v115_v23 = vsel %vm27_vm8, 0, %v113_v21 }
  0xa8   :  { %v92_v63 = vsub.s32 0, %v90_v62  ;;  %v119_v27 = vadd.s32 3, %v115_v23  ;;  %v290_v31 = vand.u32 3, %v115_v23 }
  0xaa   :  { %v384_v0 = vmin.u32 %v92_v63, %v90_v62  ;;  %v120_v30 = vand.u32 3, %v119_v27  ;;  %vm295_vm10 = vcmp.eq.s32.totalorder %v290_v31, 2  ;;  %vm292_vm12 = vcmp.eq.s32.totalorder %v290_v31, 0 }
  0xab   :  { %vm291_vm14 = vcmp.lt.s32.totalorder %v290_v31, 2 }
  0xac   :  { %v94_v1 = vclz %v384_v0  ;;  %vm125_vm9 = vcmp.eq.s32.totalorder %v120_v30, 2  ;;  %vm122_vm11 = vcmp.eq.s32.totalorder %v120_v30, 0  ;;  %vm121_vm13 = vcmp.lt.s32.totalorder %v120_v30, 2 }
  0xae   :  { %v385_v2 = vadd.s32 4294967294, %v94_v1 }
  0xb0   :  { %vm386_vm6 = vcmp.lt.s32.totalorder %v385_v2, 0 }
  0xb1   :  { %v97_v3 = vsel %vm386_vm6, 0, %v385_v2 }
  0xb2   :  { %v98_v6 = vsub.s32 32, %v97_v3  ;;  %v102_v7 = vsub.s32 4294967266, %v97_v3  ;;  %v99_v8 = vshll.u32 %v90_v62, %v97_v3 }
  0xb4   :  { %v100_v10 = vshrl.u32 %v82_v5, %v98_v6  ;;  %v103_v11 = vadd.s32 127, %v102_v7 }
  0xb6   :  { %v101_v12 = vor.u32 %v100_v10, %v99_v8  ;;  %v104_v13 = vshll.u32 %v103_v11, 23 }
  0xb8   :  { %v105_v14 = vor.u32 4788187, %v104_v13  ;;  %v108_v16 = vcvt.s32.f32 %v101_v12 }
  0xba   :  { %v106_v15 = vand.u32 2147483647, %v105_v14 }
  0xbc   :  { %v109_v17 = vmul.f32 %v108_v16, %v106_v15 }
  0xbe   :  { %v110_v19 = vxor.u32 2147483648, %v109_v17 }
  0xc0   :  { %v111_v20 = vsel %vm28_vm7, %v110_v19, %v109_v17 }
  0xc1   :  { %v114_v22 = vsel %vm27_vm8, %v467_v4, %v111_v20 }
  0xc2   :  { %407 = vcosq.f32 %v114_v22 }
  0xc3   :  { %409 = vsinq.f32 %v114_v22 }
  0xcc   :  { %v408_v32 = vpop.eup %407 }
  0xcd   :  { %v410_v33 = vpop.eup %409  ;;  %v126_v34 = vxor.u32 2147483648, %v408_v32 }
  0xce   :  { %v123_v9 = vxor.u32 2147483648, %v410_v33 }
  0xcf   :  { %v127_v36 = vsel %vm125_vm9, %v126_v34, %v410_v33  ;;  %v297_v37 = vsel %vm295_vm10, %v126_v34, %v410_v33 }
  0xd0   :  { %v124_v38 = vsel %vm122_vm11, %v408_v32, %v123_v9  ;;  %v294_v39 = vsel %vm292_vm12, %v408_v32, %v123_v9 }
  0xd1   :  { %v128_v40 = vsel %vm121_vm13, %v124_v38, %v127_v36  ;;  %v298_v41 = vsel %vm291_vm14, %v294_v39, %v297_v37 }
  0xd2   :  { %v129_v42 = vsel %vm118_vm15, nan, %v128_v40  ;;  %v299_v43 = vsel %vm118_vm15, nan, %v298_v41 }
  0xd3   :  { %v131_v44 = vcombine.high %v129_v42, %v129_v42  ;;  %v138_v45 = vrot.slane %v129_v42, %v137_v35  ;;  %v301_v46 = vcombine.high %v299_v43, %v299_v43  ;;  %v308_v47 = vrot.slane %v299_v43, %v137_v35 }
  0xd5   :  { %v145_v48 = vrot.slane %v131_v44, %v137_v35  ;;  %v146_v49 = vcombine.high %v138_v45, %v138_v45  ;;  %v154_v50 = vrot.slane %v138_v45, %v137_v35  ;;  %v315_v51 = vrot.slane %v301_v46, %v137_v35 }
  0xd6   :  { %v316_v52 = vcombine.high %v308_v47, %v308_v47  ;;  %v324_v53 = vrot.slane %v308_v47, %v137_v35 }
  0xd7   :  { %v147_v54 = vcombine.high %v145_v48, %v145_v48  ;;  %v161_v55 = vrot.slane %v145_v48, %v137_v35  ;;  %v168_v56 = vrot.slane %v146_v49, %v137_v35  ;;  %v176_v57 = vcombine.high %v154_v50, %v154_v50  ;;  %189 = vst.msk [vmem:[#allocation2] sm:$0x1] %vm188_vm0, %v154_v50 }
  0xd8   :  { %v317_v4 = vcombine.high %v315_v51, %v315_v51  ;;  %v331_v58 = vrot.slane %v315_v51, %v137_v35  ;;  %v338_v59 = vrot.slane %v316_v52, %v137_v35  ;;  %v346_v60 = vcombine.high %v324_v53, %v324_v53  ;;  %358 = vst.msk [vmem:[#allocation2 + $0x1] sm:$0x1] %vm188_vm0, %v324_v53 }
  0xd9   :  { %v175_v61 = vrot.slane %v147_v54, %v137_v35  ;;  %v177_v62 = vcombine.high %v161_v55, %v161_v55  ;;  %v178_v63 = vcombine.high %v168_v56, %v168_v56  ;;  %190 = vst.msk [vmem:[#allocation2 + $0x2] sm:$0x1] %vm188_vm0, %v168_v56  ;;  %191 = vst.msk [vmem:[#allocation2 + $0x4] sm:$0x1] %vm188_vm0, %v176_v57 }
  0xda   :  { %193 = vst.msk [vmem:[#allocation2 + $0x8] sm:$0x1] %vm188_vm0, %v161_v55  ;;  %v345_v0 = vrot.slane %v317_v4, %v137_v35  ;;  %v347_v1 = vcombine.high %v331_v58, %v331_v58  ;;  %v348_v2 = vcombine.high %v338_v59, %v338_v59  ;;  %359 = vst.msk [vmem:[#allocation2 + $0x3] sm:$0x1] %vm188_vm0, %v338_v59 }
  0xdb   :  { %360 = vst.msk [vmem:[#allocation2 + $0x5] sm:$0x1] %vm188_vm0, %v346_v60  ;;  %362 = vst.msk [vmem:[#allocation2 + $0x9] sm:$0x1] %vm188_vm0, %v331_v58  ;;  %v179_v3 = vcombine.high %v175_v61, %v175_v61 }
  0xdc   :  { %192 = vst.msk [vmem:[#allocation2 + $0x6] sm:$0x1] %vm188_vm0, %v178_v63  ;;  %194 = vst.msk [vmem:[#allocation2 + $0xa] sm:$0x1] %vm188_vm0, %v175_v61  ;;  %v349_v5 = vcombine.high %v345_v0, %v345_v0 }
  0xdd   :  { %195 = vst.msk [vmem:[#allocation2 + $0xc] sm:$0x1] %vm188_vm0, %v177_v62  ;;  %361 = vst.msk [vmem:[#allocation2 + $0x7] sm:$0x1] %vm188_vm0, %v348_v2 }
  0xde   :  { %363 = vst.msk [vmem:[#allocation2 + $0xb] sm:$0x1] %vm188_vm0, %v345_v0  ;;  %364 = vst.msk [vmem:[#allocation2 + $0xd] sm:$0x1] %vm188_vm0, %v347_v1 }
  0xdf   :  { %196 = vst.msk [vmem:[#allocation2 + $0xe] sm:$0x1] %vm188_vm0, %v179_v3  ;;  %365 = vst.msk [vmem:[#allocation2 + $0xf] sm:$0x1] %vm188_vm0, %v349_v5 }
  0xe0   :  { %422 = shalt.err (!%p419_p4)
}
  0xe1   :  { %s423_s16 = scalar_lea.hbm %s518_s2, 256 }
  0xe2   :  { %p424_p5 = scmp.ne.s32.totalorder %s518_s2, %s423_s16  ;;  %p427_p6 = scmp.lt.u32.totalorder %s423_s16, %s518_s2 }
  0xe4   :  { %p429_p7 = pnand %p427_p6, %p424_p5 }
  0xe6   :  { %432 = shalt.err (!%p429_p7)
}
  0xe7   :  { %s444_s21 = smov 32   ;;  %s445_s22 = smov 2  }
  0xe8   :  { %377 = dma.vmem_to_hbm [thread:$0]  %s372_s1, 256, %s518_s2, [#allocation3], %s444_s21, %s444_s21, %s445_s22  }
  0xe9   :  { %433 = dma.done.wait [#allocation3], 256  }
  0xea   :  { %434 = vsyncadd [#allocation3], 4294967040 }
  0xeb   :  { %381 = vsyncpa [#allocation3], 1 }

</bundles_post_ra>
